<compile_context>
chip_gen: v7x
topology: tpu7x:2x2x1
jax: 0.10.0
libtpu: 0.0.40
codegen_flags: <defaults>
</compile_context>

<pallas_src>
import functools

import jax
import jax.numpy as jnp
from jax.experimental import pallas as pl
from jax.experimental.pallas import tpu as pltpu


def _round_up(x, m):
    return ((x + m - 1) // m) * m


def _round_down(x, m):
    return (x // m) * m


# --------------------------------------------------------------------------
# Kernel bodies
# --------------------------------------------------------------------------
def _disj_eo_tail(conj, wd_ref, bd_ref, be_ref, out_ref, eo_scale):
    """Disjunction layer + tanh + closed-form EO constraint, write output."""
    disj = jnp.tanh(
        jnp.dot(conj.astype(wd_ref.dtype), wd_ref[...],
                preferred_element_type=jnp.float32)
        + bd_ref[...]
    )
    # W_eo is -6 off-diagonal, 0 diagonal (frozen), so d @ W_eo.T =
    # -6 * (rowsum(d) - d).  Padded disjunction columns are exactly 0
    # (zero weight columns + zero bias, tanh(0) = 0), so the row sum over the
    # padded width is exact.
    row_sum = jnp.sum(disj, axis=-1, keepdims=True)
    out_ref[...] = (eo_scale * (row_sum - disj) + be_ref[...]).astype(out_ref.dtype)


def _ndnf_eo_kernel(x_ref, wc_ref, wd_ref, bc_ref, bd_ref, be_ref, out_ref, *,
                    eo_scale, act_dtype):
    """One batch tile, conjunction weights fully VMEM-resident.

    x_ref  : (TB, n_in_p)        input tile
    wc_ref : (n_in_p, n_conj_p)  conjunction weights, transposed, zero-padded
    wd_ref : (n_conj_p, n_out_p) disjunction weights, transposed, zero-padded
    bc/bd/be_ref : (1, n)        delta-scaled bias row vectors (f32)
    out_ref: (TB, n_out_p)
    """
    pre = (jnp.dot(x_ref[...], wc_ref[...], preferred_element_type=jnp.float32)
           + bc_ref[...])
    conj = jnp.tanh(pre.astype(act_dtype))
    _disj_eo_tail(conj, wd_ref, bd_ref, be_ref, out_ref, eo_scale)


def _ndnf_eo_ktiled_kernel(x_ref, wc_ref, wd_ref, bc_ref, bd_ref, be_ref,
                           out_ref, acc_ref, *, eo_scale, act_dtype):
    """Batch tile with the conjunction matmul tiled over K (= n_in).

    Grid = (batch tiles, K tiles); K is the last ("arbitrary") axis.
    acc_ref: (TB, n_conj_p) f32 accumulator scratch.
    """
    k = pl.program_id(1)

    @pl.when(k == 0)
    def _init():
        acc_ref[...] = jnp.zeros_like(acc_ref)

    acc_ref[...] += jnp.dot(x_ref[...], wc_ref[...],
                            preferred_element_type=jnp.float32)

    @pl.when(k == pl.num_programs(1) - 1)
    def _finalize():
        conj = jnp.tanh((acc_ref[...] + bc_ref[...]).astype(act_dtype))
        _disj_eo_tail(conj, wd_ref, bd_ref, be_ref, out_ref, eo_scale)


# --------------------------------------------------------------------------
# Tiling heuristics
# --------------------------------------------------------------------------
def _pick_batch_tile(b_rounded, per_row_bytes, resident_bytes, sublane_mult,
                     max_tile, budget_bytes):
    """Largest batch tile that fits the VMEM budget.

    Caps at b_rounded // 2 when possible so the batch grid has >= 2 steps
    (keeps both TensorCores busy on 2-TC chips).
    """
    cap = min(max_tile, b_rounded)
    if b_rounded >= 2 * sublane_mult:
        cap = min(cap, max(sublane_mult, _round_down(b_rounded // 2, sublane_mult)))
    tb = max(sublane_mult, _round_down(cap, sublane_mult))
    while tb > sublane_mult and resident_bytes + tb * per_row_bytes > budget_bytes:
        tb = max(sublane_mult, _round_down(tb // 2, sublane_mult))
    return tb


# --------------------------------------------------------------------------
# Wrapper
# --------------------------------------------------------------------------
def neural_dnf_eo_forward(x, w_conj, w_disj, w_eo, delta, *,
                          max_batch_tile=2048,
                          matmul_dtype=jnp.bfloat16,
                          out_dtype=jnp.float32,
                          k_tile=None):
    """x: (B, n_in); w_conj: (n_conj, n_in); w_disj: (n_out, n_conj);
    w_eo: (n_out, n_out) (frozen: -6 off-diag, 0 diag). Returns (B, n_out)."""
    del w_eo  # frozen constant; its effect is the closed form + bias_e below.
    B, n_in = x.shape
    n_conj = w_conj.shape[0]
    n_out = w_disj.shape[0]
    f32 = jnp.float32

    # ---- weight-only bias vectors, delta folded in (hoisted out of kernel) --
    def semi_bias(abs_w, is_conj):
        max_w = jnp.max(abs_w, axis=1)
        sum_w = jnp.sum(abs_w, axis=1)
        b = (max_w - sum_w) if is_conj else (sum_w - max_w)
        return (delta * b)[None, :]                      # (1, n_features_out)

    bias_c = semi_bias(jnp.abs(w_conj.astype(f32)), True)        # (1, n_conj)
    bias_d = semi_bias(jnp.abs(w_disj.astype(f32)), False)       # (1, n_out)
    # EO layer: |W_eo| row = 6 everywhere except a 0 diagonal (frozen).
    abs_w_eo = 6.0 * (jnp.ones((n_out, n_out), f32) - jnp.eye(n_out, dtype=f32))
    bias_e = semi_bias(abs_w_eo, True)                           # (1, n_out)

    # ---- device-aware VMEM budget ------------------------------------------
    try:
        vmem_cap = int(getattr(pltpu.get_tpu_info(), "vmem_capacity_bytes",
                               64 << 20))
    except Exception:
        vmem_cap = 64 << 20
    if vmem_cap <= 0:
        vmem_cap = 64 << 20
    budget_bytes = int(0.40 * vmem_cap)          # working-set target
    vmem_limit = int(0.85 * vmem_cap)            # never exceed physical VMEM

    mm_itemsize = jnp.dtype(matmul_dtype).itemsize
    out_itemsize = jnp.dtype(out_dtype).itemsize
    # Sub-32-bit dtypes pack along sublanes: (16,128) native tile for bf16.
    sublane_mult = max(8, 32 // mm_itemsize, 32 // out_itemsize)
    act_dtype = matmul_dtype if mm_itemsize < 4 else f32

    # ---- pad lane dims to 128, decide on K tiling ---------------------------
    n_in_p = _round_up(n_in, 128)
    n_conj_p = _round_up(n_conj, 128)
    n_out_p = _round_up(n_out, 128)

    wc_full_bytes = n_in_p * n_conj_p * mm_itemsize
    if k_tile is not None:
        tk = max(128, _round_up(int(k_tile), 128))
        use_k = True
    elif wc_full_bytes > min(24 << 20, budget_bytes // 2):
        # keep each (double-buffered) wc slab around <= 8 MiB
        tk = max(128, _round_down((8 << 20) // max(1, n_conj_p * mm_itemsize), 128))
        use_k = True
    else:
        tk = n_in_p
        use_k = False

    if use_k:
        n_in_p = _round_up(n_in, tk)
        num_k = n_in_p // tk
    else:
        num_k = 1
    # TODO(synk): wd (n_conj_p x n_out_p) is not tiled; extremely wide
    # disjunction layers would additionally need an N/K split on that matmul.

    # ---- batch tile ----------------------------------------------------------
    # Resident (per-buffer x2, conservative even with single-buffered weights).
    resident_bytes = 2 * (tk * n_conj_p * mm_itemsize
                          + n_conj_p * n_out_p * mm_itemsize
                          + 4 * (n_conj_p + 2 * n_out_p))
    per_row_bytes = 2 * (tk * mm_itemsize + n_out_p * out_itemsize)   # x / out DMA
    per_row_bytes += 4 * (2 * n_conj_p + 2 * n_out_p)                 # f32 temporaries

    b_rounded = _round_up(max(B, 1), sublane_mult)
    TB = _pick_batch_tile(b_rounded, per_row_bytes, resident_bytes,
                          sublane_mult, max_batch_tile, budget_bytes)
    B_p = _round_up(B, TB)
    grid_b = B_p // TB

    # ---- pad / cast operands -------------------------------------------------
    def pad2(a, rows, cols):
        return jnp.pad(a, ((0, rows - a.shape[0]), (0, cols - a.shape[1])))

    x_p = pad2(x.astype(f32), B_p, n_in_p).astype(matmul_dtype)
    wc_t = pad2(w_conj.T.astype(f32), n_in_p, n_conj_p).astype(matmul_dtype)
    wd_t = pad2(w_disj.T.astype(f32), n_conj_p, n_out_p).astype(matmul_dtype)
    bc = pad2(bias_c, 1, n_conj_p)
    bd = pad2(bias_d, 1, n_out_p)
    be = pad2(bias_e, 1, n_out_p)

    # ---- cost estimate (scheduler hint) --------------------------------------
    cost = pl.CostEstimate(
        flops=int(2 * B_p * (n_in_p * n_conj_p + n_conj_p * n_out_p)
                  + 4 * B_p * n_out_p),
        transcendentals=int(B_p * (n_conj_p + n_out_p)),
        bytes_accessed=int(B_p * n_in_p * mm_itemsize
                           + B_p * n_out_p * out_itemsize
                           + (n_in_p * n_conj_p + n_conj_p * n_out_p) * mm_itemsize
                           + 4 * (n_conj_p + 2 * n_out_p)),
    )

    eo_scale = -6.0  # matches eo_constraint.weights.data.fill_(-6), frozen.

    def run(weight_pipeline_mode):
        def const_spec(shape, index_map):
            # Constant-index blocks: fetched once; single-buffer when supported.
            if weight_pipeline_mode is None:
                return pl.BlockSpec(shape, index_map)
            return pl.BlockSpec(shape, index_map,
                                pipeline_mode=weight_pipeline_mode)

        if use_k:
            kernel = functools.partial(_ndnf_eo_ktiled_kernel,
                                       eo_scale=eo_scale, act_dtype=act_dtype)
            grid = (grid_b, num_k)
            in_specs = [
                pl.BlockSpec((TB, tk), lambda i, k: (i, k)),           # x
                pl.BlockSpec((tk, n_conj_p), lambda i, k: (k, 0)),     # wc slab
                const_spec((n_conj_p, n_out_p), lambda i, k: (0, 0)),  # wd
                const_spec((1, n_conj_p), lambda i, k: (0, 0)),        # bc
                const_spec((1, n_out_p), lambda i, k: (0, 0)),         # bd
                const_spec((1, n_out_p), lambda i, k: (0, 0)),         # be
            ]
            out_spec = pl.BlockSpec((TB, n_out_p), lambda i, k: (i, 0))
            scratch = [pltpu.VMEM((TB, n_conj_p), jnp.float32)]
            dim_sem = ("parallel", "arbitrary")
        else:
            kernel = functools.partial(_ndnf_eo_kernel,
                                       eo_scale=eo_scale, act_dtype=act_dtype)
            grid = (grid_b,)
            in_specs = [
                pl.BlockSpec((TB, n_in_p), lambda i: (i, 0)),          # x
                const_spec((n_in_p, n_conj_p), lambda i: (0, 0)),      # wc
                const_spec((n_conj_p, n_out_p), lambda i: (0, 0)),     # wd
                const_spec((1, n_conj_p), lambda i: (0, 0)),           # bc
                const_spec((1, n_out_p), lambda i: (0, 0)),            # bd
                const_spec((1, n_out_p), lambda i: (0, 0)),            # be
            ]
            out_spec = pl.BlockSpec((TB, n_out_p), lambda i: (i, 0))
            scratch = []
            dim_sem = ("parallel",)

        return pl.pallas_call(
            kernel,
            out_shape=jax.ShapeDtypeStruct((B_p, n_out_p), out_dtype),
            grid=grid,
            in_specs=in_specs,
            out_specs=out_spec,
            scratch_shapes=scratch,
            compiler_params=pltpu.CompilerParams(
                dimension_semantics=dim_sem,
                vmem_limit_bytes=vmem_limit,
            ),
            cost_estimate=cost,
        )(x_p, wc_t, wd_t, bc, bd, be)

    weight_mode = pl.Buffered(1) if hasattr(pl, "Buffered") else None
    if weight_mode is not None:
        try:
            out = run(weight_mode)
        except Exception:
            # Installed Pallas rejects single-buffered constant blocks — fall
            # back to default double buffering (still correct, slightly more
            # resident VMEM).
            out = run(None)
    else:
        out = run(None)

    return out[:B, :n_out]


# --------------------------------------------------------------------------
# Pure-JAX reference mirroring the PyTorch module.
# --------------------------------------------------------------------------
def neural_dnf_eo_reference(x, w_conj, w_disj, w_eo, delta):
    def semi(x_, w, is_conj):
        abs_w = jnp.abs(w)
        max_w = jnp.max(abs_w, axis=1)
        sum_w = jnp.sum(abs_w, axis=1)
        bias = (max_w - sum_w) if is_conj else (sum_w - max_w)
        return x_ @ w.T + delta * bias[None, :]

    c = jnp.tanh(semi(x, w_conj, True))
    d = jnp.tanh(semi(c, w_disj, False))
    return semi(d, w_eo, True)


if __name__ == "__main__":
    delta = 0.5
    key = jax.random.PRNGKey(0)
    keys = jax.random.split(key, 9)

    def make_case(kx_, kc_, kd_, B, n_in, n_conj, n_out):
        # Input expected in [-1, 1]; weight_init_type='normal' -> N(0, 0.1).
        x = jax.random.uniform(kx_, (B, n_in), jnp.float32,
                               minval=-1.0, maxval=1.0)
        w_conj = 0.1 * jax.random.normal(kc_, (n_conj, n_in), jnp.float32)
        w_disj = 0.1 * jax.random.normal(kd_, (n_out, n_conj), jnp.float32)
        # EO constraint: fill(-6), zero diagonal, frozen.
        w_eo = -6.0 * (jnp.ones((n_out, n_out), jnp.float32)
                       - jnp.eye(n_out, dtype=jnp.float32))
        return x, w_conj, w_disj, w_eo

    # Case 1: small shapes, exact f32 matmul path — tight check vs reference.
    x1, wc1, wd1, weo1 = make_case(keys[0], keys[1], keys[2], 8, 32, 16, 8)
    out1 = jax.block_until_ready(
        neural_dnf_eo_forward(x1, wc1, wd1, weo1, delta,
                              matmul_dtype=jnp.float32))
    ref1 = neural_dnf_eo_reference(x1, wc1, wd1, weo1, delta)
    assert out1.shape == (8, 8)
    assert jnp.allclose(out1, ref1, atol=1e-4, rtol=1e-4)

    # Case 2: default bf16 matmul path, B > tile (16-aligned batch tiling).
    x2, wc2, wd2, weo2 = make_case(keys[3], keys[4], keys[5], 40, 48, 24, 10)
    out2 = jax.block_until_ready(
        neural_dnf_eo_forward(x2, wc2, wd2, weo2, delta))
    ref2 = neural_dnf_eo_reference(x2, wc2, wd2, weo2, delta)
    assert out2.shape == (40, 10)
    assert jnp.allclose(out2, ref2, atol=0.25, rtol=2e-2)

    # Case 3: forced K-tiled path (multi-step reduction grid), f32, tight check.
    x3, wc3, wd3, weo3 = make_case(keys[6], keys[7], keys[8], 24, 200, 32, 12)
    out3 = jax.block_until_ready(
        neural_dnf_eo_forward(x3, wc3, wd3, weo3, delta,
                              matmul_dtype=jnp.float32, k_tile=128))
    ref3 = neural_dnf_eo_reference(x3, wc3, wd3, weo3, delta)
    assert out3.shape == (24, 12)
    assert jnp.allclose(out3, ref3, atol=1e-4, rtol=1e-4)

    print("KERNEL_OK")
</pallas_src>

<mosaic_0001>
module attributes {stable_mosaic.version = 11 : i64} {
  func.func @_ndnf_eo_kernel(%arg0: i32, %arg1: memref<8x128xf32, #tpu.memory_space<vmem>>, %arg2: memref<128x128xf32, #tpu.memory_space<vmem>>, %arg3: memref<128x128xf32, #tpu.memory_space<vmem>>, %arg4: memref<1x128xf32, #tpu.memory_space<vmem>>, %arg5: memref<1x128xf32, #tpu.memory_space<vmem>>, %arg6: memref<1x128xf32, #tpu.memory_space<vmem>>, %arg7: memref<8x128xf32, #tpu.memory_space<vmem>>) attributes {dimension_semantics = [#tpu.dimension_semantics<parallel>], iteration_bounds = array<i64: 1>, scalar_prefetch = 0 : i64, scratch_operands = 0 : i64, tpu.core_type = #tpu.core_type<tc>, window_params = [{transform_indices = @transform_0, window_bounds = array<i64: 8, 128>}, {pipeline_mode = #tpu.pipeline_mode<synchronous>, transform_indices = @transform_1, window_bounds = array<i64: 128, 128>}, {pipeline_mode = #tpu.pipeline_mode<synchronous>, transform_indices = @transform_2, window_bounds = array<i64: 128, 128>}, {pipeline_mode = #tpu.pipeline_mode<synchronous>, transform_indices = @transform_3, window_bounds = array<i64: 1, 128>}, {pipeline_mode = #tpu.pipeline_mode<synchronous>, transform_indices = @transform_4, window_bounds = array<i64: 1, 128>}, {pipeline_mode = #tpu.pipeline_mode<synchronous>, transform_indices = @transform_5, window_bounds = array<i64: 1, 128>}, {transform_indices = @transform_6, window_bounds = array<i64: 8, 128>}]} {
    %c0 = arith.constant 0 : index
    %c0_0 = arith.constant 0 : index
    %0 = vector.load %arg1[%c0, %c0_0] : memref<8x128xf32, #tpu.memory_space<vmem>>, vector<8x128xf32>
    %c0_1 = arith.constant 0 : index
    %c0_2 = arith.constant 0 : index
    %1 = vector.load %arg2[%c0_1, %c0_2] : memref<128x128xf32, #tpu.memory_space<vmem>>, vector<128x128xf32>
    %cst = arith.constant dense<0.000000e+00> : vector<8x128xf32>
    %2 = tpu.matmul %0, %1, %cst {dimension_numbers = #tpu.dot_dimension_numbers<[1], [0], [0], [1], [0, 0, 1, 1], [], []>} : vector<8x128xf32>, vector<128x128xf32>, vector<8x128xf32> -> vector<8x128xf32>
    %c0_3 = arith.constant 0 : index
    %c0_4 = arith.constant 0 : index
    %3 = vector.load %arg4[%c0_3, %c0_4] : memref<1x128xf32, #tpu.memory_space<vmem>>, vector<1x128xf32>
    %4 = vector.broadcast %3 : vector<1x128xf32> to vector<8x128xf32>
    %5 = arith.addf %2, %4 : vector<8x128xf32>
    %6 = math.tanh %5 : vector<8x128xf32>
    %c0_5 = arith.constant 0 : index
    %c0_6 = arith.constant 0 : index
    %7 = vector.load %arg3[%c0_5, %c0_6] : memref<128x128xf32, #tpu.memory_space<vmem>>, vector<128x128xf32>
    %cst_7 = arith.constant dense<0.000000e+00> : vector<8x128xf32>
    %8 = tpu.matmul %6, %7, %cst_7 {dimension_numbers = #tpu.dot_dimension_numbers<[1], [0], [0], [1], [0, 0, 1, 1], [], []>} : vector<8x128xf32>, vector<128x128xf32>, vector<8x128xf32> -> vector<8x128xf32>
    %c0_8 = arith.constant 0 : index
    %c0_9 = arith.constant 0 : index
    %9 = vector.load %arg5[%c0_8, %c0_9] : memref<1x128xf32, #tpu.memory_space<vmem>>, vector<1x128xf32>
    %10 = vector.broadcast %9 : vector<1x128xf32> to vector<8x128xf32>
    %11 = arith.addf %8, %10 : vector<8x128xf32>
    %12 = math.tanh %11 : vector<8x128xf32>
    %cst_10 = arith.constant dense<0.000000e+00> : vector<8xf32>
    %13 = vector.multi_reduction <add>, %12, %cst_10 [1] : vector<8x128xf32> to vector<8xf32>
    %14 = vector.shape_cast %13 : vector<8xf32> to vector<8x1xf32>
    %15 = vector.broadcast %14 : vector<8x1xf32> to vector<8x128xf32>
    %16 = arith.subf %15, %12 : vector<8x128xf32>
    %cst_11 = arith.constant -6.000000e+00 : f32
    %17 = vector.broadcast %cst_11 : f32 to vector<8x128xf32>
    %18 = arith.mulf %17, %16 : vector<8x128xf32>
    %c0_12 = arith.constant 0 : index
    %c0_13 = arith.constant 0 : index
    %19 = vector.load %arg6[%c0_12, %c0_13] : memref<1x128xf32, #tpu.memory_space<vmem>>, vector<1x128xf32>
    %20 = vector.broadcast %19 : vector<1x128xf32> to vector<8x128xf32>
    %21 = arith.addf %18, %20 : vector<8x128xf32>
    %c0_14 = arith.constant 0 : index
    %c0_15 = arith.constant 0 : index
    %22 = vector.load %arg7[%c0_14, %c0_15] : memref<8x128xf32, #tpu.memory_space<vmem>>, vector<8x128xf32>
    tpu.vector_store %arg7[%c0_14, %c0_15], %21 {strides = array<i32>} : memref<8x128xf32, #tpu.memory_space<vmem>>, vector<8x128xf32>,
    return
  }
  func.func @transform_0(%arg0: i32) -> (i32, i32) {
    %c0_i32 = arith.constant 0 : i32
    %c0_i32_0 = arith.constant 0 : i32
    return %arg0, %c0_i32 : i32, i32
  }
  func.func @transform_1(%arg0: i32) -> (i32, i32) {
    %c0_i32 = arith.constant 0 : i32
    %c0_i32_0 = arith.constant 0 : i32
    %c0_i32_1 = arith.constant 0 : i32
    return %c0_i32, %c0_i32_0 : i32, i32
  }
  func.func @transform_2(%arg0: i32) -> (i32, i32) {
    %c0_i32 = arith.constant 0 : i32
    %c0_i32_0 = arith.constant 0 : i32
    %c0_i32_1 = arith.constant 0 : i32
    return %c0_i32, %c0_i32_0 : i32, i32
  }
  func.func @transform_3(%arg0: i32) -> (i32, i32) {
    %c0_i32 = arith.constant 0 : i32
    %c0_i32_0 = arith.constant 0 : i32
    %c0_i32_1 = arith.constant 0 : i32
    return %c0_i32, %c0_i32_0 : i32, i32
  }
  func.func @transform_4(%arg0: i32) -> (i32, i32) {
    %c0_i32 = arith.constant 0 : i32
    %c0_i32_0 = arith.constant 0 : i32
    %c0_i32_1 = arith.constant 0 : i32
    return %c0_i32, %c0_i32_0 : i32, i32
  }
  func.func @transform_5(%arg0: i32) -> (i32, i32) {
    %c0_i32 = arith.constant 0 : i32
    %c0_i32_0 = arith.constant 0 : i32
    %c0_i32_1 = arith.constant 0 : i32
    return %c0_i32, %c0_i32_0 : i32, i32
  }
  func.func @transform_6(%arg0: i32) -> (i32, i32) {
    %c0_i32 = arith.constant 0 : i32
    %c0_i32_0 = arith.constant 0 : i32
    return %arg0, %c0_i32 : i32, i32
  }
}

module attributes {stable_mosaic.version = 11 : i64} {
  func.func @_ndnf_eo_kernel(%arg0: i32, %arg1: memref<8x128xf32, #tpu.memory_space<vmem>>, %arg2: memref<128x128xf32, #tpu.memory_space<vmem>>, %arg3: memref<128x128xf32, #tpu.memory_space<vmem>>, %arg4: memref<1x128xf32, #tpu.memory_space<vmem>>, %arg5: memref<1x128xf32, #tpu.memory_space<vmem>>, %arg6: memref<1x128xf32, #tpu.memory_space<vmem>>, %arg7: memref<8x128xf32, #tpu.memory_space<vmem>>) attributes {dimension_semantics = [#tpu.dimension_semantics<parallel>], iteration_bounds = array<i64: 1>, scalar_prefetch = 0 : i64, scratch_operands = 0 : i64, tpu.core_type = #tpu.core_type<tc>, window_params = [{transform_indices = @transform_0, window_bounds = array<i64: 8, 128>}, {pipeline_mode = #tpu.pipeline_mode<synchronous>, transform_indices = @transform_1, window_bounds = array<i64: 128, 128>}, {pipeline_mode = #tpu.pipeline_mode<synchronous>, transform_indices = @transform_2, window_bounds = array<i64: 128, 128>}, {pipeline_mode = #tpu.pipeline_mode<synchronous>, transform_indices = @transform_3, window_bounds = array<i64: 1, 128>}, {pipeline_mode = #tpu.pipeline_mode<synchronous>, transform_indices = @transform_4, window_bounds = array<i64: 1, 128>}, {pipeline_mode = #tpu.pipeline_mode<synchronous>, transform_indices = @transform_5, window_bounds = array<i64: 1, 128>}, {transform_indices = @transform_6, window_bounds = array<i64: 8, 128>}]} {
    %c0 = arith.constant 0 : index
    %c0_0 = arith.constant 0 : index
    %0 = vector.load %arg1[%c0, %c0_0] : memref<8x128xf32, #tpu.memory_space<vmem>>, vector<8x128xf32>
    %c0_1 = arith.constant 0 : index
    %c0_2 = arith.constant 0 : index
    %1 = vector.load %arg2[%c0_1, %c0_2] : memref<128x128xf32, #tpu.memory_space<vmem>>, vector<128x128xf32>
    %cst = arith.constant dense<0.000000e+00> : vector<8x128xf32>
    %2 = tpu.matmul %0, %1, %cst {dimension_numbers = #tpu.dot_dimension_numbers<[1], [0], [0], [1], [0, 0, 1, 1], [], []>} : vector<8x128xf32>, vector<128x128xf32>, vector<8x128xf32> -> vector<8x128xf32>
    %c0_3 = arith.constant 0 : index
    %c0_4 = arith.constant 0 : index
    %3 = vector.load %arg4[%c0_3, %c0_4] : memref<1x128xf32, #tpu.memory_space<vmem>>, vector<1x128xf32>
    %4 = vector.broadcast %3 : vector<1x128xf32> to vector<8x128xf32>
    %5 = arith.addf %2, %4 : vector<8x128xf32>
    %6 = math.tanh %5 : vector<8x128xf32>
    %c0_5 = arith.constant 0 : index
    %c0_6 = arith.constant 0 : index
    %7 = vector.load %arg3[%c0_5, %c0_6] : memref<128x128xf32, #tpu.memory_space<vmem>>, vector<128x128xf32>
    %cst_7 = arith.constant dense<0.000000e+00> : vector<8x128xf32>
    %8 = tpu.matmul %6, %7, %cst_7 {dimension_numbers = #tpu.dot_dimension_numbers<[1], [0], [0], [1], [0, 0, 1, 1], [], []>} : vector<8x128xf32>, vector<128x128xf32>, vector<8x128xf32> -> vector<8x128xf32>
    %c0_8 = arith.constant 0 : index
    %c0_9 = arith.constant 0 : index
    %9 = vector.load %arg5[%c0_8, %c0_9] : memref<1x128xf32, #tpu.memory_space<vmem>>, vector<1x128xf32>
    %10 = vector.broadcast %9 : vector<1x128xf32> to vector<8x128xf32>
    %11 = arith.addf %8, %10 : vector<8x128xf32>
    %12 = math.tanh %11 : vector<8x128xf32>
    %cst_10 = arith.constant dense<0.000000e+00> : vector<8xf32>
    %13 = vector.multi_reduction <add>, %12, %cst_10 [1] : vector<8x128xf32> to vector<8xf32>
    %14 = vector.shape_cast %13 : vector<8xf32> to vector<8x1xf32>
    %15 = vector.broadcast %14 : vector<8x1xf32> to vector<8x128xf32>
    %16 = arith.subf %15, %12 : vector<8x128xf32>
    %cst_11 = arith.constant -6.000000e+00 : f32
    %17 = vector.broadcast %cst_11 : f32 to vector<8x128xf32>
    %18 = arith.mulf %17, %16 : vector<8x128xf32>
    %c0_12 = arith.constant 0 : index
    %c0_13 = arith.constant 0 : index
    %19 = vector.load %arg6[%c0_12, %c0_13] : memref<1x128xf32, #tpu.memory_space<vmem>>, vector<1x128xf32>
    %20 = vector.broadcast %19 : vector<1x128xf32> to vector<8x128xf32>
    %21 = arith.addf %18, %20 : vector<8x128xf32>
    %c0_14 = arith.constant 0 : index
    %c0_15 = arith.constant 0 : index
    %22 = vector.load %arg7[%c0_14, %c0_15] : memref<8x128xf32, #tpu.memory_space<vmem>>, vector<8x128xf32>
    tpu.vector_store %arg7[%c0_14, %c0_15], %21 {strides = array<i32>} : memref<8x128xf32, #tpu.memory_space<vmem>>, vector<8x128xf32>,
    return
  }
  func.func @transform_0(%arg0: i32) -> (i32, i32) {
    %c0_i32 = arith.constant 0 : i32
    %c0_i32_0 = arith.constant 0 : i32
    return %arg0, %c0_i32 : i32, i32
  }
  func.func @transform_1(%arg0: i32) -> (i32, i32) {
    %c0_i32 = arith.constant 0 : i32
    %c0_i32_0 = arith.constant 0 : i32
    %c0_i32_1 = arith.constant 0 : i32
    return %c0_i32, %c0_i32_0 : i32, i32
  }
  func.func @transform_2(%arg0: i32) -> (i32, i32) {
    %c0_i32 = arith.constant 0 : i32
    %c0_i32_0 = arith.constant 0 : i32
    %c0_i32_1 = arith.constant 0 : i32
    return %c0_i32, %c0_i32_0 : i32, i32
  }
  func.func @transform_3(%arg0: i32) -> (i32, i32) {
    %c0_i32 = arith.constant 0 : i32
    %c0_i32_0 = arith.constant 0 : i32
    %c0_i32_1 = arith.constant 0 : i32
    return %c0_i32, %c0_i32_0 : i32, i32
  }
  func.func @transform_4(%arg0: i32) -> (i32, i32) {
    %c0_i32 = arith.constant 0 : i32
    %c0_i32_0 = arith.constant 0 : i32
    %c0_i32_1 = arith.constant 0 : i32
    return %c0_i32, %c0_i32_0 : i32, i32
  }
  func.func @transform_5(%arg0: i32) -> (i32, i32) {
    %c0_i32 = arith.constant 0 : i32
    %c0_i32_0 = arith.constant 0 : i32
    %c0_i32_1 = arith.constant 0 : i32
    return %c0_i32, %c0_i32_0 : i32, i32
  }
  func.func @transform_6(%arg0: i32) -> (i32, i32) {
    %c0_i32 = arith.constant 0 : i32
    %c0_i32_0 = arith.constant 0 : i32
    return %arg0, %c0_i32 : i32, i32
  }
}

</mosaic_0001>

<bundles_post_ra>
// kernel: tpu_custom_call.1
= control target key start
LH: loop header
LB: loop body
LE: loop exit
PB: predicated region body
PF: predicated region fallthrough
CT: control target
= control target key end

     0   :  { %11 = vsyncpa [#allocation3], 0  ;;  %s666_s0 = inlined_call_operand.hbm [shape: f32[8,128], index: 0, kind: input, shape index: {}]   ;;  %s667_s1 = inlined_call_operand.hbm [shape: f32[128,128], index: 1, kind: input, shape index: {}]   ;;  %s668_s2 = inlined_call_operand.hbm [shape: f32[128,128], index: 2, kind: input, shape index: {}]   ;;  %s669_s3 = inlined_call_operand.vmem [shape: f32[1,128], index: 3, kind: input, shape index: {}]   ;;  %s670_s4 = inlined_call_operand.vmem [shape: f32[1,128], index: 4, kind: input, shape index: {}]   ;;  %s671_s5 = inlined_call_operand.vmem [shape: f32[1,128], index: 5, kind: input, shape index: {}]   ;;  %s672_s6 = inlined_call_operand.hbm [shape: f32[8,128], index: 6, kind: output, shape index: {}]  }
   0x1   :  { %12 = vsyncpa [#allocation6], 0 }
   0x2   :  { %13 = vsyncpa [#allocation4], 0  ;;  %s543_s21 = smov [#allocation5]   ;;  %s449_s25 = scalar_lea.hbm %s667_s1, 2048 }
   0x3   :  { %s29_s22 = sshll.u32 %s543_s21, 4  ;;  %p450_p0 = scmp.ne.s32.totalorder %s667_s1, %s449_s25  ;;  %s30_s22 = int_to_ptr.vmem [resolvable:$true] %s29_s22 }
   0x4   :  { %p453_p1 = scmp.lt.u32.totalorder %s449_s25, %s667_s1 }
   0x6   :  { %p455_p2 = pnand %p453_p1, %p450_p0 }
   0x8   :  { %458 = shalt.err (!%p455_p2)
}
   0x9   :  { %s459_s30 = scalar_lea.vmem %s30_s22, 2048  ;;  %p464_p4 = scmp.lt.s32.totalorder %s30_s22, %s30_s22 }
   0xa   :  { %p460_p3 = scmp.ne.s32.totalorder %s30_s22, %s459_s30  ;;  %p465_p5 = scmp.lt.s32.totalorder %s459_s30, %s459_s30 }
   0xc   :  { %p466_p6 = por %p465_p5, %p464_p4 }
   0xe   :  { %p467_p7 = pnand %p466_p6, %p460_p3 }
  0x10   :  { %470 = shalt.err (!%p467_p7)
}
  0x11   :  { %s544_s7 = smov 128   ;;  %s545_s8 = smov 8  }
  0x12   :  { %35 = dma.hbm_to_vmem [thread:$0]  %s667_s1, 2048, %s30_s22, [#allocation6], %s544_s7, %s544_s7, %s545_s8  }
  0x13   :  { %s546_s11 = smov [#allocation2]   ;;  %s547_s13 = smov [#allocation7]  }
  0x14   :  { %s20_s12 = sshll.u32 %s546_s11, 4  ;;  %s41_s14 = sshll.u32 %s547_s13, 4  ;;  %s21_s12 = int_to_ptr.vmem [resolvable:$true] %s20_s12  ;;  %s42_s14 = int_to_ptr.vmem [resolvable:$true] %s41_s14 }
  0x15   :  { %s471_s17 = scalar_lea.hbm %s666_s0, 128 }
  0x16   :  { %p472_p8 = scmp.ne.s32.totalorder %s666_s0, %s471_s17  ;;  %p475_p9 = scmp.lt.u32.totalorder %s471_s17, %s666_s0 }
  0x18   :  { %p477_p10 = pnand %p475_p9, %p472_p8 }
  0x1a   :  { %480 = shalt.err (!%p477_p10)
}
  0x1b   :  { %s481_s1 = scalar_lea.vmem %s21_s12, 128  ;;  %p486_p12 = scmp.lt.s32.totalorder %s21_s12, %s21_s12 }
  0x1c   :  { %p482_p11 = scmp.ne.s32.totalorder %s21_s12, %s481_s1  ;;  %p487_p13 = scmp.lt.s32.totalorder %s481_s1, %s481_s1 }
  0x1e   :  { %p488_p0 = por %p487_p13, %p486_p12 }
  0x20   :  { %p489_p1 = pnand %p488_p0, %p482_p11 }
  0x22   :  { %492 = shalt.err (!%p489_p1)
}
  0x23   :  { %23 = dma.hbm_to_vmem [thread:$0]  %s666_s0, 128, %s21_s12, [#allocation3]  }
  0x24   :  { %s493_s26 = scalar_lea.hbm %s668_s2, 2048 }
  0x25   :  { %p494_p2 = scmp.ne.s32.totalorder %s668_s2, %s493_s26  ;;  %p497_p3 = scmp.lt.u32.totalorder %s493_s26, %s668_s2 }
  0x27   :  { %p499_p4 = pnand %p497_p3, %p494_p2 }
  0x29   :  { %502 = shalt.err (!%p499_p4)
}
  0x2a   :  { %s503_s9 = scalar_lea.vmem %s42_s14, 2048  ;;  %p508_p6 = scmp.lt.s32.totalorder %s42_s14, %s42_s14 }
  0x2b   :  { %p504_p5 = scmp.ne.s32.totalorder %s42_s14, %s503_s9  ;;  %p509_p7 = scmp.lt.s32.totalorder %s503_s9, %s503_s9 }
  0x2d   :  { %p510_p8 = por %p509_p7, %p508_p6 }
  0x2f   :  { %p511_p9 = pnand %p510_p8, %p504_p5 }
  0x31   :  { %514 = shalt.err (!%p511_p9)
}
  0x32   :  { %47 = dma.hbm_to_vmem [thread:$0]  %s668_s2, 2048, %s42_s14, [#allocation6], %s544_s7, %s544_s7, %s545_s8  }
  0x33   :  { %537 = dma.done.wait [#allocation3], 128  }
  0x34   :  { %538 = vsyncadd [#allocation3], 4294967168 }
  0x35   :  { %539 = dma.done.wait [#allocation6], 4096  }
  0x36   :  { %540 = vsyncadd [#allocation6], 4294963200  ;;  %v548_v0 = vmov 0.0|0.0   ;;  %vm549_vm0 = vmmov 0   ;;  %v550_v1 = vmov 0.0   ;;  %v64_v2 = vld [vmem:[#allocation5] sm:$0xff] }
  0x37   :  { %388 = vmatprep.subr.bf16.mxu0 %v548_v0  ;;  %350 = vmatprep.mubr.msk.f32.mxu0 %vm549_vm0, %v550_v1  ;;  %v65_v3 = vld [vmem:[#allocation5 + $0x8] sm:$0xff]  ;;  %v66_v4 = vld [vmem:[#allocation5 + $0x10] sm:$0xff]  ;;  %v67_v6 = vld [vmem:[#allocation5 + $0x18] sm:$0xff]  ;;  %s551_s13 = smov [#allocation8]  }
  0x38   :  { %412 = vmatprep.subr.bf16.mxu1 %v548_v0  ;;  %385 = vmatprep.mubr.msk.f32.mxu1 %vm549_vm0, %v550_v1  ;;  %v389_v5 = vpack.c.bf16 %v65_v3, %v64_v2  ;;  %v392_v7 = vpack.c.bf16 %v67_v6, %v66_v4  ;;  %v68_v8 = vld [vmem:[#allocation5 + $0x20] sm:$0xff]  ;;  %v69_v9 = vld [vmem:[#allocation5 + $0x28] sm:$0xff]  ;;  %v160_v12 = vld [vmem:[#allocation7 + $0x10] sm:$0xff]  ;;  %s271_s14 = sshll.u32 %s551_s13, 4  ;;  %s272_s14 = int_to_ptr.vmem [resolvable:$true] %s271_s14 }
  0x39   :  { %v158_v10 = vld [vmem:[#allocation7] sm:$0xff]  ;;  %v159_v11 = vld [vmem:[#allocation7 + $0x8] sm:$0xff]  ;;  %v161_v13 = vld [vmem:[#allocation7 + $0x18] sm:$0xff]  ;;  %v395_v14 = vpack.c.bf16 %v69_v9, %v68_v8  ;;  %s515_s15 = scalar_lea.vmem %s272_s14, 128  ;;  %p520_p11 = scmp.lt.s32.totalorder %s272_s14, %s272_s14 }
  0x3a   :  { %390 = vmatpush3.bf16.msra.mxu0 %v389_v5  ;;  %v413_v15 = vpack.c.bf16 %v159_v11, %v158_v10  ;;  %v70_v16 = vld [vmem:[#allocation5 + $0x30] sm:$0xff]  ;;  %v71_v17 = vld [vmem:[#allocation5 + $0x38] sm:$0xff]  ;;  %v416_v18 = vpack.c.bf16 %v161_v13, %v160_v12  ;;  %v162_v19 = vld [vmem:[#allocation7 + $0x20] sm:$0xff]  ;;  %p516_p10 = scmp.ne.s32.totalorder %s272_s14, %s515_s15  ;;  %p521_p12 = scmp.lt.s32.totalorder %s515_s15, %s515_s15 }
  0x3b   :  { %391 = vmatprep.subr.bf16.mxu0 %v548_v0  ;;  %v163_v20 = vld [vmem:[#allocation7 + $0x28] sm:$0xff]  ;;  %v398_v21 = vpack.c.bf16 %v71_v17, %v70_v16  ;;  %v72_v22 = vld [vmem:[#allocation5 + $0x40] sm:$0xff]  ;;  %v164_v25 = vld [vmem:[#allocation7 + $0x30] sm:$0xff] }
  0x3c   :  { %414 = vmatpush3.bf16.msra.mxu1 %v413_v15  ;;  %v73_v23 = vld [vmem:[#allocation5 + $0x48] sm:$0xff]  ;;  %v419_v24 = vpack.c.bf16 %v163_v20, %v162_v19  ;;  %v165_v26 = vld [vmem:[#allocation7 + $0x38] sm:$0xff]  ;;  %v74_v28 = vld [vmem:[#allocation5 + $0x50] sm:$0xff]  ;;  %p522_p13 = por %p521_p12, %p520_p11 }
  0x3d   :  { %415 = vmatprep.subr.bf16.mxu1 %v548_v0  ;;  %v401_v27 = vpack.c.bf16 %v73_v23, %v72_v22  ;;  %v75_v29 = vld [vmem:[#allocation5 + $0x58] sm:$0xff]  ;;  %v422_v30 = vpack.c.bf16 %v165_v26, %v164_v25  ;;  %v166_v31 = vld [vmem:[#allocation7 + $0x40] sm:$0xff]  ;;  %v167_v32 = vld [vmem:[#allocation7 + $0x48] sm:$0xff] }
  0x3e   :  { %393 = vmatpush3.bf16.msra.mxu0 %v392_v7  ;;  %v404_v33 = vpack.c.bf16 %v75_v29, %v74_v28  ;;  %v76_v34 = vld [vmem:[#allocation5 + $0x60] sm:$0xff]  ;;  %v77_v35 = vld [vmem:[#allocation5 + $0x68] sm:$0xff]  ;;  %v425_v36 = vpack.c.bf16 %v167_v32, %v166_v31  ;;  %v78_v38 = vld [vmem:[#allocation5 + $0x70] sm:$0xff]  ;;  %p523_p0 = pnand %p522_p13, %p516_p10 }
  0x3f   :  { %394 = vmatprep.subr.bf16.mxu0 %v548_v0  ;;  %v407_v37 = vpack.c.bf16 %v77_v35, %v76_v34  ;;  %v79_v39 = vld [vmem:[#allocation5 + $0x78] sm:$0xff]  ;;  %v168_v42 = vld [vmem:[#allocation7 + $0x50] sm:$0xff]  ;;  %v170_v45 = vld [vmem:[#allocation7 + $0x60] sm:$0xff] }
  0x40   :  { %417 = vmatpush3.bf16.msra.mxu1 %v416_v18  ;;  %v410_v40 = vpack.c.bf16 %v79_v39, %v78_v38  ;;  %v63_v41 = vld [vmem:[#allocation2] sm:$0xff]  ;;  %v171_v46 = vld [vmem:[#allocation7 + $0x68] sm:$0xff]  ;;  %v172_v48 = vld [vmem:[#allocation7 + $0x70] sm:$0xff] }
  0x41   :  { %418 = vmatprep.subr.bf16.mxu1 %v548_v0  ;;  %v169_v43 = vld [vmem:[#allocation7 + $0x58] sm:$0xff]  ;;  %v431_v47 = vpack.c.bf16 %v171_v46, %v170_v45 }
  0x42   :  { %396 = vmatpush3.bf16.msra.mxu0 %v395_v14  ;;  %v428_v44 = vpack.c.bf16 %v169_v43, %v168_v42  ;;  %v173_v49 = vld [vmem:[#allocation7 + $0x78] sm:$0xff] }
  0x43   :  { %397 = vmatprep.subr.bf16.mxu0 %v548_v0  ;;  %v434_v50 = vpack.c.bf16 %v173_v49, %v172_v48  ;;  %v281_v51 = vld [vmem:[%s669_s3] ss:$0 sm:$0xff] }
  0x44   :  { %420 = vmatpush3.bf16.msra.mxu1 %v419_v24  ;;  %v282_v56 = vld [vmem:[%s670_s4] ss:$0 sm:$0xff] }
  0x45   :  { %421 = vmatprep.subr.bf16.mxu1 %v548_v0  ;;  %v283_v63 = vld [vmem:[%s671_s5] ss:$0 sm:$0xff] }
  0x46   :  { %399 = vmatpush3.bf16.msra.mxu0 %v398_v21 }
  0x47   :  { %400 = vmatprep.subr.bf16.mxu0 %v548_v0 }
  0x48   :  { %423 = vmatpush3.bf16.msra.mxu1 %v422_v30 }
  0x49   :  { %424 = vmatprep.subr.bf16.mxu1 %v548_v0 }
  0x4a   :  { %402 = vmatpush3.bf16.msra.mxu0 %v401_v27 }
  0x4b   :  { %403 = vmatprep.subr.bf16.mxu0 %v548_v0 }
  0x4c   :  { %426 = vmatpush3.bf16.msra.mxu1 %v425_v36 }
  0x4d   :  { %427 = vmatprep.subr.bf16.mxu1 %v548_v0 }
  0x4e   :  { %405 = vmatpush3.bf16.msra.mxu0 %v404_v33 }
  0x4f   :  { %406 = vmatprep.subr.bf16.mxu0 %v548_v0 }
  0x50   :  { %429 = vmatpush3.bf16.msra.mxu1 %v428_v44 }
  0x51   :  { %430 = vmatprep.subr.bf16.mxu1 %v548_v0 }
  0x52   :  { %408 = vmatpush3.bf16.msra.mxu0 %v407_v37 }
  0x53   :  { %409 = vmatprep.subr.bf16.mxu0 %v548_v0 }
  0x54   :  { %432 = vmatpush3.bf16.msra.mxu1 %v431_v47 }
  0x55   :  { %433 = vmatprep.subr.bf16.mxu1 %v548_v0 }
  0x56   :  { %411 = vmatpush3.bf16.msra.mxu0 %v410_v40 }
  0x58   :  { %435 = vmatpush3.bf16.msra.mxu1 %v434_v50 }
  0x59   :  { %351 = vmatmul.mubr.f32.vlgmr.msra.gmra.mrb[0].mxu0 %v63_v41 }
 0x12c   :  { %v153_v52 = vpop.f32.mrb[0].mxu0 }
 0x12d   :  { %v154_v53 = vadd.f32 %v281_v51, %v153_v52  ;;  %v352_v54 = vpop.f32.mrb[1].mxu0 }
 0x12f   :  { %445 = vtanh.f32 %v154_v53 }
 0x139   :  { %v446_v55 = vpop.eup %445 }
 0x13a   :  { %386 = vmatmul.mubr.f32.vlgmr.msra.gmra.mrb[0].mxu1 %v446_v55 }
 0x20d   :  { %v247_v57 = vpop.f32.mrb[0].mxu1 }
 0x20e   :  { %v248_v58 = vadd.f32 %v282_v56, %v247_v57  ;;  %v387_v59 = vpop.f32.mrb[1].mxu1 }
 0x210   :  { %447 = vtanh.f32 %v248_v58 }
 0x21a   :  { %v448_v60 = vpop.eup %447 }
 0x21b   :  { %252 = vadd.xlane.f32.xlu0 %v448_v60 }
 0x2a8   :  { %v253_v61 = vpop.xlane.xlu0 %252 }
 0x2a9   :  { %v254_v62 = vsub.f32 %v253_v61, %v448_v60 }
 0x2ab   :  { %v255_v0 = vmul.f32 -6.0, %v254_v62 }
 0x2ad   :  { %v263_v1 = vadd.f32 %v283_v63, %v255_v0 }
 0x2af   :  { %264 = vst [vmem:[#allocation8] sm:$0xff] %v263_v1 }
 0x2b0   :  { %526 = shalt.err (!%p523_p0)
}
 0x2b1   :  { %s527_s17 = scalar_lea.hbm %s672_s6, 128 }
 0x2b2   :  { %p528_p1 = scmp.ne.s32.totalorder %s672_s6, %s527_s17  ;;  %p531_p2 = scmp.lt.u32.totalorder %s527_s17, %s672_s6 }
 0x2b4   :  { %p533_p3 = pnand %p531_p2, %p528_p1 }
 0x2b6   :  { %536 = shalt.err (!%p533_p3)
}
 0x2b7   :  { %274 = dma.vmem_to_hbm [thread:$0]  %s272_s14, 128, %s672_s6, [#allocation4]  }
 0x2b8   :  { %541 = dma.done.wait [#allocation4], 128  }
 0x2b9   :  { %542 = vsyncadd [#allocation4], 4294967168 }
 0x2ba   :  { %278 = vsyncpa [#allocation3], 1 }
 0x2bb   :  { %279 = vsyncpa [#allocation6], 1 }
 0x2bc   :  { %280 = vsyncpa [#allocation4], 1 }

// kernel: tpu_custom_call.1
= control target key start
LH: loop header
LB: loop body
LE: loop exit
PB: predicated region body
PF: predicated region fallthrough
CT: control target
= control target key end

     0   :  { %11 = vsyncpa [#allocation3], 0  ;;  %s666_s0 = inlined_call_operand.hbm [shape: f32[8,128], index: 0, kind: input, shape index: {}]   ;;  %s667_s1 = inlined_call_operand.hbm [shape: f32[128,128], index: 1, kind: input, shape index: {}]   ;;  %s668_s2 = inlined_call_operand.hbm [shape: f32[128,128], index: 2, kind: input, shape index: {}]   ;;  %s669_s3 = inlined_call_operand.vmem [shape: f32[1,128], index: 3, kind: input, shape index: {}]   ;;  %s670_s4 = inlined_call_operand.vmem [shape: f32[1,128], index: 4, kind: input, shape index: {}]   ;;  %s671_s5 = inlined_call_operand.vmem [shape: f32[1,128], index: 5, kind: input, shape index: {}]   ;;  %s672_s6 = inlined_call_operand.hbm [shape: f32[8,128], index: 6, kind: output, shape index: {}]  }
   0x1   :  { %12 = vsyncpa [#allocation6], 0 }
   0x2   :  { %13 = vsyncpa [#allocation4], 0  ;;  %s543_s21 = smov [#allocation5]   ;;  %s449_s25 = scalar_lea.hbm %s667_s1, 2048 }
   0x3   :  { %s29_s22 = sshll.u32 %s543_s21, 4  ;;  %p450_p0 = scmp.ne.s32.totalorder %s667_s1, %s449_s25  ;;  %s30_s22 = int_to_ptr.vmem [resolvable:$true] %s29_s22 }
   0x4   :  { %p453_p1 = scmp.lt.u32.totalorder %s449_s25, %s667_s1 }
   0x6   :  { %p455_p2 = pnand %p453_p1, %p450_p0 }
   0x8   :  { %458 = shalt.err (!%p455_p2)
}
   0x9   :  { %s459_s30 = scalar_lea.vmem %s30_s22, 2048  ;;  %p464_p4 = scmp.lt.s32.totalorder %s30_s22, %s30_s22 }
   0xa   :  { %p460_p3 = scmp.ne.s32.totalorder %s30_s22, %s459_s30  ;;  %p465_p5 = scmp.lt.s32.totalorder %s459_s30, %s459_s30 }
   0xc   :  { %p466_p6 = por %p465_p5, %p464_p4 }
   0xe   :  { %p467_p7 = pnand %p466_p6, %p460_p3 }
  0x10   :  { %470 = shalt.err (!%p467_p7)
}
  0x11   :  { %s544_s7 = smov 128   ;;  %s545_s8 = smov 8  }
  0x12   :  { %35 = dma.hbm_to_vmem [thread:$0]  %s667_s1, 2048, %s30_s22, [#allocation6], %s544_s7, %s544_s7, %s545_s8  }
  0x13   :  { %s546_s11 = smov [#allocation2]   ;;  %s547_s13 = smov [#allocation7]  }
  0x14   :  { %s20_s12 = sshll.u32 %s546_s11, 4  ;;  %s41_s14 = sshll.u32 %s547_s13, 4  ;;  %s21_s12 = int_to_ptr.vmem [resolvable:$true] %s20_s12  ;;  %s42_s14 = int_to_ptr.vmem [resolvable:$true] %s41_s14 }
  0x15   :  { %s471_s17 = scalar_lea.hbm %s666_s0, 128 }
  0x16   :  { %p472_p8 = scmp.ne.s32.totalorder %s666_s0, %s471_s17  ;;  %p475_p9 = scmp.lt.u32.totalorder %s471_s17, %s666_s0 }
  0x18   :  { %p477_p10 = pnand %p475_p9, %p472_p8 }
  0x1a   :  { %480 = shalt.err (!%p477_p10)
}
  0x1b   :  { %s481_s1 = scalar_lea.vmem %s21_s12, 128  ;;  %p486_p12 = scmp.lt.s32.totalorder %s21_s12, %s21_s12 }
  0x1c   :  { %p482_p11 = scmp.ne.s32.totalorder %s21_s12, %s481_s1  ;;  %p487_p13 = scmp.lt.s32.totalorder %s481_s1, %s481_s1 }
  0x1e   :  { %p488_p0 = por %p487_p13, %p486_p12 }
  0x20   :  { %p489_p1 = pnand %p488_p0, %p482_p11 }
  0x22   :  { %492 = shalt.err (!%p489_p1)
}
  0x23   :  { %23 = dma.hbm_to_vmem [thread:$0]  %s666_s0, 128, %s21_s12, [#allocation3]  }
  0x24   :  { %s493_s26 = scalar_lea.hbm %s668_s2, 2048 }
  0x25   :  { %p494_p2 = scmp.ne.s32.totalorder %s668_s2, %s493_s26  ;;  %p497_p3 = scmp.lt.u32.totalorder %s493_s26, %s668_s2 }
  0x27   :  { %p499_p4 = pnand %p497_p3, %p494_p2 }
  0x29   :  { %502 = shalt.err (!%p499_p4)
}
  0x2a   :  { %s503_s9 = scalar_lea.vmem %s42_s14, 2048  ;;  %p508_p6 = scmp.lt.s32.totalorder %s42_s14, %s42_s14 }
  0x2b   :  { %p504_p5 = scmp.ne.s32.totalorder %s42_s14, %s503_s9  ;;  %p509_p7 = scmp.lt.s32.totalorder %s503_s9, %s503_s9 }
  0x2d   :  { %p510_p8 = por %p509_p7, %p508_p6 }
  0x2f   :  { %p511_p9 = pnand %p510_p8, %p504_p5 }
  0x31   :  { %514 = shalt.err (!%p511_p9)
}
  0x32   :  { %47 = dma.hbm_to_vmem [thread:$0]  %s668_s2, 2048, %s42_s14, [#allocation6], %s544_s7, %s544_s7, %s545_s8  }
  0x33   :  { %537 = dma.done.wait [#allocation3], 128  }
  0x34   :  { %538 = vsyncadd [#allocation3], 4294967168 }
  0x35   :  { %539 = dma.done.wait [#allocation6], 4096  }
  0x36   :  { %540 = vsyncadd [#allocation6], 4294963200  ;;  %v548_v0 = vmov 0.0|0.0   ;;  %vm549_vm0 = vmmov 0   ;;  %v550_v1 = vmov 0.0   ;;  %v64_v2 = vld [vmem:[#allocation5] sm:$0xff] }
  0x37   :  { %388 = vmatprep.subr.bf16.mxu0 %v548_v0  ;;  %350 = vmatprep.mubr.msk.f32.mxu0 %vm549_vm0, %v550_v1  ;;  %v65_v3 = vld [vmem:[#allocation5 + $0x8] sm:$0xff]  ;;  %v66_v4 = vld [vmem:[#allocation5 + $0x10] sm:$0xff]  ;;  %v67_v6 = vld [vmem:[#allocation5 + $0x18] sm:$0xff]  ;;  %s551_s13 = smov [#allocation8]  }
  0x38   :  { %412 = vmatprep.subr.bf16.mxu1 %v548_v0  ;;  %385 = vmatprep.mubr.msk.f32.mxu1 %vm549_vm0, %v550_v1  ;;  %v389_v5 = vpack.c.bf16 %v65_v3, %v64_v2  ;;  %v392_v7 = vpack.c.bf16 %v67_v6, %v66_v4  ;;  %v68_v8 = vld [vmem:[#allocation5 + $0x20] sm:$0xff]  ;;  %v69_v9 = vld [vmem:[#allocation5 + $0x28] sm:$0xff]  ;;  %v160_v12 = vld [vmem:[#allocation7 + $0x10] sm:$0xff]  ;;  %s271_s14 = sshll.u32 %s551_s13, 4  ;;  %s272_s14 = int_to_ptr.vmem [resolvable:$true] %s271_s14 }
  0x39   :  { %v158_v10 = vld [vmem:[#allocation7] sm:$0xff]  ;;  %v159_v11 = vld [vmem:[#allocation7 + $0x8] sm:$0xff]  ;;  %v161_v13 = vld [vmem:[#allocation7 + $0x18] sm:$0xff]  ;;  %v395_v14 = vpack.c.bf16 %v69_v9, %v68_v8  ;;  %s515_s15 = scalar_lea.vmem %s272_s14, 128  ;;  %p520_p11 = scmp.lt.s32.totalorder %s272_s14, %s272_s14 }
  0x3a   :  { %390 = vmatpush3.bf16.msra.mxu0 %v389_v5  ;;  %v413_v15 = vpack.c.bf16 %v159_v11, %v158_v10  ;;  %v70_v16 = vld [vmem:[#allocation5 + $0x30] sm:$0xff]  ;;  %v71_v17 = vld [vmem:[#allocation5 + $0x38] sm:$0xff]  ;;  %v416_v18 = vpack.c.bf16 %v161_v13, %v160_v12  ;;  %v162_v19 = vld [vmem:[#allocation7 + $0x20] sm:$0xff]  ;;  %p516_p10 = scmp.ne.s32.totalorder %s272_s14, %s515_s15  ;;  %p521_p12 = scmp.lt.s32.totalorder %s515_s15, %s515_s15 }
  0x3b   :  { %391 = vmatprep.subr.bf16.mxu0 %v548_v0  ;;  %v163_v20 = vld [vmem:[#allocation7 + $0x28] sm:$0xff]  ;;  %v398_v21 = vpack.c.bf16 %v71_v17, %v70_v16  ;;  %v72_v22 = vld [vmem:[#allocation5 + $0x40] sm:$0xff]  ;;  %v164_v25 = vld [vmem:[#allocation7 + $0x30] sm:$0xff] }
  0x3c   :  { %414 = vmatpush3.bf16.msra.mxu1 %v413_v15  ;;  %v73_v23 = vld [vmem:[#allocation5 + $0x48] sm:$0xff]  ;;  %v419_v24 = vpack.c.bf16 %v163_v20, %v162_v19  ;;  %v165_v26 = vld [vmem:[#allocation7 + $0x38] sm:$0xff]  ;;  %v74_v28 = vld [vmem:[#allocation5 + $0x50] sm:$0xff]  ;;  %p522_p13 = por %p521_p12, %p520_p11 }
  0x3d   :  { %415 = vmatprep.subr.bf16.mxu1 %v548_v0  ;;  %v401_v27 = vpack.c.bf16 %v73_v23, %v72_v22  ;;  %v75_v29 = vld [vmem:[#allocation5 + $0x58] sm:$0xff]  ;;  %v422_v30 = vpack.c.bf16 %v165_v26, %v164_v25  ;;  %v166_v31 = vld [vmem:[#allocation7 + $0x40] sm:$0xff]  ;;  %v167_v32 = vld [vmem:[#allocation7 + $0x48] sm:$0xff] }
  0x3e   :  { %393 = vmatpush3.bf16.msra.mxu0 %v392_v7  ;;  %v404_v33 = vpack.c.bf16 %v75_v29, %v74_v28  ;;  %v76_v34 = vld [vmem:[#allocation5 + $0x60] sm:$0xff]  ;;  %v77_v35 = vld [vmem:[#allocation5 + $0x68] sm:$0xff]  ;;  %v425_v36 = vpack.c.bf16 %v167_v32, %v166_v31  ;;  %v78_v38 = vld [vmem:[#allocation5 + $0x70] sm:$0xff]  ;;  %p523_p0 = pnand %p522_p13, %p516_p10 }
  0x3f   :  { %394 = vmatprep.subr.bf16.mxu0 %v548_v0  ;;  %v407_v37 = vpack.c.bf16 %v77_v35, %v76_v34  ;;  %v79_v39 = vld [vmem:[#allocation5 + $0x78] sm:$0xff]  ;;  %v168_v42 = vld [vmem:[#allocation7 + $0x50] sm:$0xff]  ;;  %v170_v45 = vld [vmem:[#allocation7 + $0x60] sm:$0xff] }
  0x40   :  { %417 = vmatpush3.bf16.msra.mxu1 %v416_v18  ;;  %v410_v40 = vpack.c.bf16 %v79_v39, %v78_v38  ;;  %v63_v41 = vld [vmem:[#allocation2] sm:$0xff]  ;;  %v171_v46 = vld [vmem:[#allocation7 + $0x68] sm:$0xff]  ;;  %v172_v48 = vld [vmem:[#allocation7 + $0x70] sm:$0xff] }
  0x41   :  { %418 = vmatprep.subr.bf16.mxu1 %v548_v0  ;;  %v169_v43 = vld [vmem:[#allocation7 + $0x58] sm:$0xff]  ;;  %v431_v47 = vpack.c.bf16 %v171_v46, %v170_v45 }
  0x42   :  { %396 = vmatpush3.bf16.msra.mxu0 %v395_v14  ;;  %v428_v44 = vpack.c.bf16 %v169_v43, %v168_v42  ;;  %v173_v49 = vld [vmem:[#allocation7 + $0x78] sm:$0xff] }
  0x43   :  { %397 = vmatprep.subr.bf16.mxu0 %v548_v0  ;;  %v434_v50 = vpack.c.bf16 %v173_v49, %v172_v48  ;;  %v281_v51 = vld [vmem:[%s669_s3] ss:$0 sm:$0xff] }
  0x44   :  { %420 = vmatpush3.bf16.msra.mxu1 %v419_v24  ;;  %v282_v56 = vld [vmem:[%s670_s4] ss:$0 sm:$0xff] }
  0x45   :  { %421 = vmatprep.subr.bf16.mxu1 %v548_v0  ;;  %v283_v63 = vld [vmem:[%s671_s5] ss:$0 sm:$0xff] }
  0x46   :  { %399 = vmatpush3.bf16.msra.mxu0 %v398_v21 }
  0x47   :  { %400 = vmatprep.subr.bf16.mxu0 %v548_v0 }
  0x48   :  { %423 = vmatpush3.bf16.msra.mxu1 %v422_v30 }
  0x49   :  { %424 = vmatprep.subr.bf16.mxu1 %v548_v0 }
  0x4a   :  { %402 = vmatpush3.bf16.msra.mxu0 %v401_v27 }
  0x4b   :  { %403 = vmatprep.subr.bf16.mxu0 %v548_v0 }
  0x4c   :  { %426 = vmatpush3.bf16.msra.mxu1 %v425_v36 }
  0x4d   :  { %427 = vmatprep.subr.bf16.mxu1 %v548_v0 }
  0x4e   :  { %405 = vmatpush3.bf16.msra.mxu0 %v404_v33 }
  0x4f   :  { %406 = vmatprep.subr.bf16.mxu0 %v548_v0 }
  0x50   :  { %429 = vmatpush3.bf16.msra.mxu1 %v428_v44 }
  0x51   :  { %430 = vmatprep.subr.bf16.mxu1 %v548_v0 }
  0x52   :  { %408 = vmatpush3.bf16.msra.mxu0 %v407_v37 }
  0x53   :  { %409 = vmatprep.subr.bf16.mxu0 %v548_v0 }
  0x54   :  { %432 = vmatpush3.bf16.msra.mxu1 %v431_v47 }
  0x55   :  { %433 = vmatprep.subr.bf16.mxu1 %v548_v0 }
  0x56   :  { %411 = vmatpush3.bf16.msra.mxu0 %v410_v40 }
  0x58   :  { %435 = vmatpush3.bf16.msra.mxu1 %v434_v50 }
  0x59   :  { %351 = vmatmul.mubr.f32.vlgmr.msra.gmra.mrb[0].mxu0 %v63_v41 }
 0x12c   :  { %v153_v52 = vpop.f32.mrb[0].mxu0 }
 0x12d   :  { %v154_v53 = vadd.f32 %v281_v51, %v153_v52  ;;  %v352_v54 = vpop.f32.mrb[1].mxu0 }
 0x12f   :  { %445 = vtanh.f32 %v154_v53 }
 0x139   :  { %v446_v55 = vpop.eup %445 }
 0x13a   :  { %386 = vmatmul.mubr.f32.vlgmr.msra.gmra.mrb[0].mxu1 %v446_v55 }
 0x20d   :  { %v247_v57 = vpop.f32.mrb[0].mxu1 }
 0x20e   :  { %v248_v58 = vadd.f32 %v282_v56, %v247_v57  ;;  %v387_v59 = vpop.f32.mrb[1].mxu1 }
 0x210   :  { %447 = vtanh.f32 %v248_v58 }
 0x21a   :  { %v448_v60 = vpop.eup %447 }
 0x21b   :  { %252 = vadd.xlane.f32.xlu0 %v448_v60 }
 0x2a8   :  { %v253_v61 = vpop.xlane.xlu0 %252 }
 0x2a9   :  { %v254_v62 = vsub.f32 %v253_v61, %v448_v60 }
 0x2ab   :  { %v255_v0 = vmul.f32 -6.0, %v254_v62 }
 0x2ad   :  { %v263_v1 = vadd.f32 %v283_v63, %v255_v0 }
 0x2af   :  { %264 = vst [vmem:[#allocation8] sm:$0xff] %v263_v1 }
 0x2b0   :  { %526 = shalt.err (!%p523_p0)
}
 0x2b1   :  { %s527_s17 = scalar_lea.hbm %s672_s6, 128 }
 0x2b2   :  { %p528_p1 = scmp.ne.s32.totalorder %s672_s6, %s527_s17  ;;  %p531_p2 = scmp.lt.u32.totalorder %s527_s17, %s672_s6 }
 0x2b4   :  { %p533_p3 = pnand %p531_p2, %p528_p1 }
 0x2b6   :  { %536 = shalt.err (!%p533_p3)
}
 0x2b7   :  { %274 = dma.vmem_to_hbm [thread:$0]  %s272_s14, 128, %s672_s6, [#allocation4]  }
 0x2b8   :  { %541 = dma.done.wait [#allocation4], 128  }
 0x2b9   :  { %542 = vsyncadd [#allocation4], 4294967168 }
 0x2ba   :  { %278 = vsyncpa [#allocation3], 1 }
 0x2bb   :  { %279 = vsyncpa [#allocation6], 1 }
 0x2bc   :  { %280 = vsyncpa [#allocation4], 1 }

</bundles_post_ra>
